<compile_context>
chip_gen: v7x
topology: tpu7x:2x2x1
jax: 0.10.0
libtpu: 0.0.40
codegen_flags: <defaults>
</compile_context>

<pallas_src>
import functools

import jax
import jax.numpy as jnp
from jax.experimental import pallas as pl
from jax.experimental.pallas import tpu as pltpu


_LANE = 128
_SUBLANE = 8


def _round_up(x, m):
    return ((x + m - 1) // m) * m


def _pad2(a, rows, cols):
    a = jnp.asarray(a, jnp.float32)
    if a.shape == (rows, cols):
        return a
    return jnp.pad(a, ((0, rows - a.shape[0]), (0, cols - a.shape[1])))


def _pad1(a, n):
    a = jnp.asarray(a, jnp.float32)
    if a.shape[0] == n:
        return a
    return jnp.pad(a, (0, n - a.shape[0]))


def _fused_mlp_kernel(*refs, n_hidden):
    """Fused MLP on one batch tile.

    Ref order: x, w_in, b_in, [w_hid_stack, b_hid_stack,] w_out, b_out, out.
    Hidden width is lane-padded; x / output feature dims are unpadded.
    Zero-padded lanes stay exactly 0 (tanh(0)=0, zero weight rows/cols).
    """
    if n_hidden > 0:
        (x_ref, w_in_ref, b_in_ref, w_hid_ref, b_hid_ref,
         w_out_ref, b_out_ref, o_ref) = refs
    else:
        (x_ref, w_in_ref, b_in_ref, w_out_ref, b_out_ref, o_ref) = refs
        w_hid_ref = b_hid_ref = None

    cdt = w_in_ref.dtype  # MXU operand dtype (f32 default, bf16 optional)

    # in_layer + tanh; activation stays a VMEM-resident value (never HBM).
    h = jnp.dot(x_ref[...], w_in_ref[...], preferred_element_type=jnp.float32)
    h = jnp.tanh(h + b_in_ref[...])

    # Hidden layers: static unroll (n_hidden is a compile-time Python int).
    for layer in range(n_hidden):
        h = jnp.dot(h.astype(cdt), w_hid_ref[layer],
                    preferred_element_type=jnp.float32)
        h = jnp.tanh(h + b_hid_ref[layer])

    # out_layer, identity output activation; unpadded (tb, out_f) store.
    y = jnp.dot(h.astype(cdt), w_out_ref[...],
                preferred_element_type=jnp.float32)
    o_ref[...] = (y + b_out_ref[...]).astype(o_ref.dtype)


def prepare_mlp_params(params, compute_dtype=jnp.float32):
    """One-time weight prep. params: list of (W, b), W = (in_feat, out_feat).

    Layer order: in_layer, n_layers hidden layers, out_layer. Hidden width is
    padded to a lane multiple; the in_layer K dim only to a sublane multiple;
    the output feature dim is left unpadded.
    """
    n_total = len(params)
    assert n_total >= 2, "need at least in_layer and out_layer"
    n_hidden = n_total - 2

    in_f, hid_f = params[0][0].shape
    out_f = params[-1][0].shape[1]
    in_p = _round_up(in_f, _SUBLANE)   # K of in_layer: sublane multiple only
    hid_p = _round_up(hid_f, _LANE)    # resident hidden width: lane dense

    w_in, b_in = params[0]
    w_out, b_out = params[-1]

    prepped = dict(
        n_hidden=n_hidden, in_f=in_f, out_f=out_f, in_p=in_p, hid_p=hid_p,
        compute_dtype=compute_dtype,
        w_in=_pad2(w_in, in_p, hid_p).astype(compute_dtype),
        b_in=_pad1(b_in, hid_p).reshape(1, hid_p),               # f32 bias
        w_out=_pad2(w_out, hid_p, out_f).astype(compute_dtype),
        b_out=jnp.asarray(b_out, jnp.float32).reshape(1, out_f),  # f32 bias
    )
    if n_hidden > 0:
        prepped["w_hid"] = jnp.stack(
            [_pad2(w, hid_p, hid_p) for (w, _) in params[1:-1]]
        ).astype(compute_dtype)
        prepped["b_hid"] = jnp.stack(
            [_pad1(b, hid_p).reshape(1, hid_p) for (_, b) in params[1:-1]])
    return prepped


def mlp_policy_forward(prepped, x, *, batch_tile=2048):
    """Run the fused MLP forward. `prepped` comes from prepare_mlp_params."""
    n_hidden = prepped["n_hidden"]
    in_f, out_f = prepped["in_f"], prepped["out_f"]
    in_p, hid_p = prepped["in_p"], prepped["hid_p"]
    cdt = prepped["compute_dtype"]

    batch = x.shape[0]
    assert x.shape[1] == in_f

    # Batch tiling: one tile for small batches; otherwise ~batch_tile rows per
    # grid step, nudging the tile count even (v7x: both TCs get equal shares).
    if batch <= batch_tile:
        tb = _round_up(batch, _SUBLANE)
    else:
        n_tiles = -(-batch // batch_tile)
        if n_tiles % 2 == 1:
            n_tiles += 1
        tb = _round_up(-(-batch // n_tiles), _SUBLANE)
    batch_pad = _round_up(batch, tb)

    xp = x.astype(cdt)
    if batch_pad != batch or in_p != in_f:
        xp = jnp.pad(xp, ((0, batch_pad - batch), (0, in_p - in_f)))

    def _resident(shape):
        # Constant index_map -> block never changes; single buffer suffices.
        return pl.BlockSpec(shape, lambda *_: (0,) * len(shape),
                            pipeline_mode=pl.Buffered(1))

    inputs = [xp, prepped["w_in"], prepped["b_in"]]
    in_specs = [
        # Batch-tiled x; last block dim equals the full (unpadded-to-128)
        # feature dim, so the DMA is contiguous and not 90% padding.
        pl.BlockSpec((tb, in_p), lambda i: (i, 0)),
        _resident((in_p, hid_p)),
        _resident((1, hid_p)),
    ]
    if n_hidden > 0:
        inputs += [prepped["w_hid"], prepped["b_hid"]]
        in_specs += [
            _resident((n_hidden, hid_p, hid_p)),
            _resident((n_hidden, 1, hid_p)),
        ]
    inputs += [prepped["w_out"], prepped["b_out"]]
    in_specs += [
        _resident((hid_p, out_f)),
        _resident((1, out_f)),
    ]

    kernel = functools.partial(_fused_mlp_kernel, n_hidden=n_hidden)

    out = pl.pallas_call(
        kernel,
        out_shape=jax.ShapeDtypeStruct((batch_pad, out_f), jnp.float32),
        grid=(batch_pad // tb,),
        in_specs=in_specs,
        # Unpadded output: last dim equals the full array dim (legal), so we
        # write out_f lanes per row instead of 128 and skip the slice pass.
        out_specs=pl.BlockSpec((tb, out_f), lambda i: (i, 0)),
        compiler_params=pltpu.CompilerParams(
            dimension_semantics=("parallel",),        # shards across TCs (v7x)
            vmem_limit_bytes=64 * 1024 * 1024,        # v5e default is only 16 MiB
        ),
    )(*inputs)

    if batch_pad != batch:
        out = out[:batch]
    return out


def init_mlp_params(key, n_layers, hidden_size, input_size, output_size):
    """Deterministic params mimicking nn.Linear default init U(+/- 1/sqrt(fan_in)).

    Weights are stored pre-transposed as (in_features, out_features).
    """
    params = []
    dims = [(input_size, hidden_size)]
    dims += [(hidden_size, hidden_size) for _ in range(n_layers)]
    dims += [(hidden_size, output_size)]
    for (fan_in, fan_out) in dims:
        key, kw, kb = jax.random.split(key, 3)
        bound = 1.0 / jnp.sqrt(float(fan_in))
        w_t = jax.random.uniform(
            kw, (fan_in, fan_out), jnp.float32, minval=-bound, maxval=bound)
        b = jax.random.uniform(
            kb, (fan_out,), jnp.float32, minval=-bound, maxval=bound)
        params.append((w_t, b))
    return params


def mlp_policy_ref(params, x):
    """Pure-JAX reference (tanh hidden activation, identity output activation)."""
    n_total = len(params)
    h = x
    for idx, (w_t, b) in enumerate(params):
        h = h @ w_t + b
        if idx != n_total - 1:
            h = jnp.tanh(h)
    return h


if __name__ == "__main__":
    key = jax.random.PRNGKey(0)
    n_layers = 2
    hidden_size = 32
    input_size = 16
    output_size = 8
    batch = 8

    key, kparams, kx, kx2 = jax.random.split(key, 4)
    params = init_mlp_params(kparams, n_layers, hidden_size, input_size, output_size)
    prepped = prepare_mlp_params(params)  # one-time pad/stack (not per call)

    # Main check: small batch, single grid step.
    x = jax.random.normal(kx, (batch, input_size), jnp.float32)
    out = jax.block_until_ready(mlp_policy_forward(prepped, x))
    ref = mlp_policy_ref(params, x)
    assert out.shape == (batch, output_size)
    assert jnp.allclose(out, ref, atol=1e-5, rtol=1e-5)

    # Second check: non-multiple-of-8 batch + multi-tile grid (batch padding,
    # resident single-buffered weights across grid steps, row slice-off).
    x2 = jax.random.normal(kx2, (20, input_size), jnp.float32)
    out2 = jax.block_until_ready(mlp_policy_forward(prepped, x2, batch_tile=8))
    ref2 = mlp_policy_ref(params, x2)
    assert out2.shape == (20, output_size)
    assert jnp.allclose(out2, ref2, atol=1e-5, rtol=1e-5)

    print("KERNEL_OK")
</pallas_src>

<mosaic_0001>
module attributes {stable_mosaic.version = 11 : i64} {
  func.func @_fused_mlp_kernel(%arg0: i32, %arg1: memref<8x16xf32, #tpu.memory_space<vmem>>, %arg2: memref<16x128xf32, #tpu.memory_space<vmem>>, %arg3: memref<1x128xf32, #tpu.memory_space<vmem>>, %arg4: memref<2x128x128xf32, #tpu.memory_space<vmem>>, %arg5: memref<2x1x128xf32, #tpu.memory_space<vmem>>, %arg6: memref<128x8xf32, #tpu.memory_space<vmem>>, %arg7: memref<1x8xf32, #tpu.memory_space<vmem>>, %arg8: memref<8x8xf32, #tpu.memory_space<vmem>>) attributes {dimension_semantics = [#tpu.dimension_semantics<parallel>], iteration_bounds = array<i64: 1>, scalar_prefetch = 0 : i64, scratch_operands = 0 : i64, tpu.core_type = #tpu.core_type<tc>, window_params = [{transform_indices = @transform_0, window_bounds = array<i64: 8, 16>}, {pipeline_mode = #tpu.pipeline_mode<synchronous>, transform_indices = @transform_1, window_bounds = array<i64: 16, 128>}, {pipeline_mode = #tpu.pipeline_mode<synchronous>, transform_indices = @transform_2, window_bounds = array<i64: 1, 128>}, {pipeline_mode = #tpu.pipeline_mode<synchronous>, transform_indices = @transform_3, window_bounds = array<i64: 2, 128, 128>}, {pipeline_mode = #tpu.pipeline_mode<synchronous>, transform_indices = @transform_4, window_bounds = array<i64: 2, 1, 128>}, {pipeline_mode = #tpu.pipeline_mode<synchronous>, transform_indices = @transform_5, window_bounds = array<i64: 128, 8>}, {pipeline_mode = #tpu.pipeline_mode<synchronous>, transform_indices = @transform_6, window_bounds = array<i64: 1, 8>}, {transform_indices = @transform_7, window_bounds = array<i64: 8, 8>}]} {
    %c0 = arith.constant 0 : index
    %c0_0 = arith.constant 0 : index
    %0 = vector.load %arg1[%c0, %c0_0] : memref<8x16xf32, #tpu.memory_space<vmem>>, vector<8x16xf32>
    %c0_1 = arith.constant 0 : index
    %c0_2 = arith.constant 0 : index
    %1 = vector.load %arg2[%c0_1, %c0_2] : memref<16x128xf32, #tpu.memory_space<vmem>>, vector<16x128xf32>
    %cst = arith.constant dense<0.000000e+00> : vector<8x128xf32>
    %2 = tpu.matmul %0, %1, %cst {dimension_numbers = #tpu.dot_dimension_numbers<[1], [0], [0], [1], [0, 0, 1, 1], [], []>} : vector<8x16xf32>, vector<16x128xf32>, vector<8x128xf32> -> vector<8x128xf32>
    %c0_3 = arith.constant 0 : index
    %c0_4 = arith.constant 0 : index
    %3 = vector.load %arg3[%c0_3, %c0_4] : memref<1x128xf32, #tpu.memory_space<vmem>>, vector<1x128xf32>
    %4 = vector.broadcast %3 : vector<1x128xf32> to vector<8x128xf32>
    %5 = arith.addf %2, %4 : vector<8x128xf32>
    %6 = math.tanh %5 : vector<8x128xf32>
    %c0_5 = arith.constant 0 : index
    %c0_6 = arith.constant 0 : index
    %c0_7 = arith.constant 0 : index
    %7 = vector.load %arg4[%c0_5, %c0_6, %c0_7] : memref<2x128x128xf32, #tpu.memory_space<vmem>>, vector<1x128x128xf32>
    %8 = vector.shape_cast %7 : vector<1x128x128xf32> to vector<128x128xf32>
    %cst_8 = arith.constant dense<0.000000e+00> : vector<8x128xf32>
    %9 = tpu.matmul %6, %8, %cst_8 {dimension_numbers = #tpu.dot_dimension_numbers<[1], [0], [0], [1], [0, 0, 1, 1], [], []>} : vector<8x128xf32>, vector<128x128xf32>, vector<8x128xf32> -> vector<8x128xf32>
    %c0_9 = arith.constant 0 : index
    %c0_10 = arith.constant 0 : index
    %c0_11 = arith.constant 0 : index
    %10 = vector.load %arg5[%c0_9, %c0_10, %c0_11] : memref<2x1x128xf32, #tpu.memory_space<vmem>>, vector<1x1x128xf32>
    %11 = vector.shape_cast %10 : vector<1x1x128xf32> to vector<1x128xf32>
    %12 = vector.broadcast %11 : vector<1x128xf32> to vector<8x128xf32>
    %13 = arith.addf %9, %12 : vector<8x128xf32>
    %14 = math.tanh %13 : vector<8x128xf32>
    %c1 = arith.constant 1 : index
    %c0_12 = arith.constant 0 : index
    %c0_13 = arith.constant 0 : index
    %15 = vector.load %arg4[%c1, %c0_12, %c0_13] : memref<2x128x128xf32, #tpu.memory_space<vmem>>, vector<1x128x128xf32>
    %16 = vector.shape_cast %15 : vector<1x128x128xf32> to vector<128x128xf32>
    %cst_14 = arith.constant dense<0.000000e+00> : vector<8x128xf32>
    %17 = tpu.matmul %14, %16, %cst_14 {dimension_numbers = #tpu.dot_dimension_numbers<[1], [0], [0], [1], [0, 0, 1, 1], [], []>} : vector<8x128xf32>, vector<128x128xf32>, vector<8x128xf32> -> vector<8x128xf32>
    %c1_15 = arith.constant 1 : index
    %c0_16 = arith.constant 0 : index
    %c0_17 = arith.constant 0 : index
    %18 = vector.load %arg5[%c1_15, %c0_16, %c0_17] : memref<2x1x128xf32, #tpu.memory_space<vmem>>, vector<1x1x128xf32>
    %19 = vector.shape_cast %18 : vector<1x1x128xf32> to vector<1x128xf32>
    %20 = vector.broadcast %19 : vector<1x128xf32> to vector<8x128xf32>
    %21 = arith.addf %17, %20 : vector<8x128xf32>
    %22 = math.tanh %21 : vector<8x128xf32>
    %c0_18 = arith.constant 0 : index
    %c0_19 = arith.constant 0 : index
    %23 = vector.load %arg6[%c0_18, %c0_19] : memref<128x8xf32, #tpu.memory_space<vmem>>, vector<128x8xf32>
    %cst_20 = arith.constant dense<0.000000e+00> : vector<8x8xf32>
    %24 = tpu.matmul %22, %23, %cst_20 {dimension_numbers = #tpu.dot_dimension_numbers<[1], [0], [0], [1], [0, 0, 1, 1], [], []>} : vector<8x128xf32>, vector<128x8xf32>, vector<8x8xf32> -> vector<8x8xf32>
    %c0_21 = arith.constant 0 : index
    %c0_22 = arith.constant 0 : index
    %25 = vector.load %arg7[%c0_21, %c0_22] : memref<1x8xf32, #tpu.memory_space<vmem>>, vector<1x8xf32>
    %26 = vector.broadcast %25 : vector<1x8xf32> to vector<8x8xf32>
    %27 = arith.addf %24, %26 : vector<8x8xf32>
    %c0_23 = arith.constant 0 : index
    %c0_24 = arith.constant 0 : index
    %28 = vector.load %arg8[%c0_23, %c0_24] : memref<8x8xf32, #tpu.memory_space<vmem>>, vector<8x8xf32>
    tpu.vector_store %arg8[%c0_23, %c0_24], %27 {strides = array<i32>} : memref<8x8xf32, #tpu.memory_space<vmem>>, vector<8x8xf32>,
    return
  }
  func.func @transform_0(%arg0: i32) -> (i32, i32) {
    %c0_i32 = arith.constant 0 : i32
    %c0_i32_0 = arith.constant 0 : i32
    return %arg0, %c0_i32 : i32, i32
  }
  func.func @transform_1(%arg0: i32) -> (i32, i32) {
    %c0_i32 = arith.constant 0 : i32
    %c0_i32_0 = arith.constant 0 : i32
    %c0_i32_1 = arith.constant 0 : i32
    return %c0_i32, %c0_i32_0 : i32, i32
  }
  func.func @transform_2(%arg0: i32) -> (i32, i32) {
    %c0_i32 = arith.constant 0 : i32
    %c0_i32_0 = arith.constant 0 : i32
    %c0_i32_1 = arith.constant 0 : i32
    return %c0_i32, %c0_i32_0 : i32, i32
  }
  func.func @transform_3(%arg0: i32) -> (i32, i32, i32) {
    %c0_i32 = arith.constant 0 : i32
    %c0_i32_0 = arith.constant 0 : i32
    %c0_i32_1 = arith.constant 0 : i32
    %c0_i32_2 = arith.constant 0 : i32
    return %c0_i32, %c0_i32_0, %c0_i32_1 : i32, i32, i32
  }
  func.func @transform_4(%arg0: i32) -> (i32, i32, i32) {
    %c0_i32 = arith.constant 0 : i32
    %c0_i32_0 = arith.constant 0 : i32
    %c0_i32_1 = arith.constant 0 : i32
    %c0_i32_2 = arith.constant 0 : i32
    return %c0_i32, %c0_i32_0, %c0_i32_1 : i32, i32, i32
  }
  func.func @transform_5(%arg0: i32) -> (i32, i32) {
    %c0_i32 = arith.constant 0 : i32
    %c0_i32_0 = arith.constant 0 : i32
    %c0_i32_1 = arith.constant 0 : i32
    return %c0_i32, %c0_i32_0 : i32, i32
  }
  func.func @transform_6(%arg0: i32) -> (i32, i32) {
    %c0_i32 = arith.constant 0 : i32
    %c0_i32_0 = arith.constant 0 : i32
    %c0_i32_1 = arith.constant 0 : i32
    return %c0_i32, %c0_i32_0 : i32, i32
  }
  func.func @transform_7(%arg0: i32) -> (i32, i32) {
    %c0_i32 = arith.constant 0 : i32
    %c0_i32_0 = arith.constant 0 : i32
    return %arg0, %c0_i32 : i32, i32
  }
}

</mosaic_0001>

<bundles_post_ra>
// kernel: tpu_custom_call.1
= control target key start
LH: loop header
LB: loop body
LE: loop exit
PB: predicated region body
PF: predicated region fallthrough
CT: control target
= control target key end

     0   :  { %12 = vsyncpa [#allocation3], 0  ;;  %s1150_s0 = inlined_call_operand.hbm [shape: f32[8,16], index: 0, kind: input, shape index: {}]   ;;  %s1151_s1 = inlined_call_operand.hbm [shape: f32[16,128], index: 1, kind: input, shape index: {}]   ;;  %s1152_s2 = inlined_call_operand.hbm [shape: f32[1,128], index: 2, kind: input, shape index: {}]   ;;  %s1153_s3 = inlined_call_operand.hbm [shape: f32[2,128,128], index: 3, kind: input, shape index: {}]   ;;  %s1154_s4 = inlined_call_operand.hbm [shape: f32[2,1,128], index: 4, kind: input, shape index: {}]   ;;  %s1155_s5 = inlined_call_operand.hbm [shape: f32[128,8], index: 5, kind: input, shape index: {}]   ;;  %s1156_s6 = inlined_call_operand.hbm [shape: f32[1,8], index: 6, kind: input, shape index: {}]   ;;  %s1157_s7 = inlined_call_operand.hbm [shape: f32[8,8], index: 7, kind: output, shape index: {}]  }
   0x1   :  { %13 = vsyncpa [#allocation6], 0 }
   0x2   :  { %14 = vsyncpa [#allocation9], 0 }
   0x3   :  { %15 = vsyncpa [#allocation12], 0 }
   0x4   :  { %16 = vsyncpa [#allocation4], 0  ;;  %s957_s24 = smov [#allocation5]   ;;  %s771_s28 = scalar_lea.hbm %s1151_s1, 256 }
   0x5   :  { %s32_s25 = sshll.u32 %s957_s24, 4  ;;  %p772_p0 = scmp.ne.s32.totalorder %s1151_s1, %s771_s28  ;;  %s33_s25 = int_to_ptr.vmem [resolvable:$true] %s32_s25 }
   0x6   :  { %p775_p1 = scmp.lt.u32.totalorder %s771_s28, %s1151_s1 }
   0x8   :  { %p777_p2 = pnand %p775_p1, %p772_p0 }
   0xa   :  { %780 = shalt.err (!%p777_p2)
}
   0xb   :  { %s781_s10 = scalar_lea.vmem %s33_s25, 256  ;;  %p786_p4 = scmp.lt.s32.totalorder %s33_s25, %s33_s25 }
   0xc   :  { %p782_p3 = scmp.ne.s32.totalorder %s33_s25, %s781_s10  ;;  %p787_p5 = scmp.lt.s32.totalorder %s781_s10, %s781_s10 }
   0xe   :  { %p788_p6 = por %p787_p5, %p786_p4 }
  0x10   :  { %p789_p7 = pnand %p788_p6, %p782_p3 }
  0x12   :  { %792 = shalt.err (!%p789_p7)
}
  0x13   :  { %s958_s11 = smov 128   ;;  %s959_s12 = smov 8  }
  0x14   :  { %38 = dma.hbm_to_vmem [thread:$0]  %s1151_s1, 256, %s33_s25, [#allocation6], %s958_s11, %s958_s11, %s959_s12  }
  0x15   :  { %s960_s15 = smov [#allocation8]   ;;  %s961_s17 = smov [#allocation11]  }
  0x16   :  { %s54_s16 = sshll.u32 %s960_s15, 4  ;;  %s78_s18 = sshll.u32 %s961_s17, 4  ;;  %s55_s16 = int_to_ptr.vmem [resolvable:$true] %s54_s16  ;;  %s79_s18 = int_to_ptr.vmem [resolvable:$true] %s78_s18 }
  0x17   :  { %s793_s21 = scalar_lea.hbm %s1153_s3, 4096 }
  0x18   :  { %p794_p8 = scmp.ne.s32.totalorder %s1153_s3, %s793_s21  ;;  %p797_p9 = scmp.lt.u32.totalorder %s793_s21, %s1153_s3 }
  0x1a   :  { %p799_p10 = pnand %p797_p9, %p794_p8 }
  0x1c   :  { %802 = shalt.err (!%p799_p10)
}
  0x1d   :  { %s803_s1 = scalar_lea.vmem %s55_s16, 4096  ;;  %p808_p12 = scmp.lt.s32.totalorder %s55_s16, %s55_s16 }
  0x1e   :  { %p804_p11 = scmp.ne.s32.totalorder %s55_s16, %s803_s1  ;;  %p809_p13 = scmp.lt.s32.totalorder %s803_s1, %s803_s1 }
  0x20   :  { %p810_p0 = por %p809_p13, %p808_p12 }
  0x22   :  { %p811_p1 = pnand %p810_p0, %p804_p11 }
  0x24   :  { %814 = shalt.err (!%p811_p1)
}
  0x25   :  { %60 = dma.hbm_to_vmem [thread:$0]  %s1153_s3, 4096, %s55_s16, [#allocation9], %s958_s11, %s958_s11, %s959_s12  }
  0x26   :  { %s815_s30 = scalar_lea.hbm %s1155_s5, 2048 }
  0x27   :  { %p816_p2 = scmp.ne.s32.totalorder %s1155_s5, %s815_s30  ;;  %p819_p3 = scmp.lt.u32.totalorder %s815_s30, %s1155_s5 }
  0x29   :  { %p821_p4 = pnand %p819_p3, %p816_p2 }
  0x2b   :  { %824 = shalt.err (!%p821_p4)
}
  0x2c   :  { %s825_s14 = scalar_lea.vmem %s79_s18, 2048  ;;  %p830_p6 = scmp.lt.s32.totalorder %s79_s18, %s79_s18 }
  0x2d   :  { %p826_p5 = scmp.ne.s32.totalorder %s79_s18, %s825_s14  ;;  %p831_p7 = scmp.lt.s32.totalorder %s825_s14, %s825_s14 }
  0x2f   :  { %p832_p8 = por %p831_p7, %p830_p6 }
  0x31   :  { %p833_p9 = pnand %p832_p8, %p826_p5 }
  0x33   :  { %836 = shalt.err (!%p833_p9)
}
  0x34   :  { %84 = dma.hbm_to_vmem [thread:$0]  %s1155_s5, 2048, %s79_s18, [#allocation12], %s958_s11, %s958_s11, %s959_s12  }
  0x35   :  { %s962_s16 = smov [#allocation2]   ;;  %s963_s19 = smov [#allocation7]  }
  0x36   :  { %s23_s17 = sshll.u32 %s962_s16, 4  ;;  %s45_s20 = sshll.u32 %s963_s19, 4  ;;  %s24_s17 = int_to_ptr.vmem [resolvable:$true] %s23_s17  ;;  %s46_s20 = int_to_ptr.vmem [resolvable:$true] %s45_s20 }
  0x37   :  { %s837_s23 = scalar_lea.hbm %s1150_s0, 128 }
  0x38   :  { %p838_p10 = scmp.ne.s32.totalorder %s1150_s0, %s837_s23  ;;  %p841_p11 = scmp.lt.u32.totalorder %s837_s23, %s1150_s0 }
  0x3a   :  { %p843_p12 = pnand %p841_p11, %p838_p10 }
  0x3c   :  { %846 = shalt.err (!%p843_p12)
}
  0x3d   :  { %s847_s5 = scalar_lea.vmem %s24_s17, 128  ;;  %p852_p0 = scmp.lt.s32.totalorder %s24_s17, %s24_s17 }
  0x3e   :  { %p848_p13 = scmp.ne.s32.totalorder %s24_s17, %s847_s5  ;;  %p853_p1 = scmp.lt.s32.totalorder %s847_s5, %s847_s5 }
  0x40   :  { %p854_p2 = por %p853_p1, %p852_p0 }
  0x42   :  { %p855_p3 = pnand %p854_p2, %p848_p13 }
  0x44   :  { %858 = shalt.err (!%p855_p3)
}
  0x45   :  { %26 = dma.hbm_to_vmem [thread:$0]  %s1150_s0, 128, %s24_s17, [#allocation3]  }
  0x46   :  { %s859_s28 = scalar_lea.hbm %s1152_s2, 16 }
  0x47   :  { %p860_p4 = scmp.ne.s32.totalorder %s1152_s2, %s859_s28  ;;  %p863_p5 = scmp.lt.u32.totalorder %s859_s28, %s1152_s2 }
  0x49   :  { %p865_p6 = pnand %p863_p5, %p860_p4 }
  0x4b   :  { %868 = shalt.err (!%p865_p6)
}
  0x4c   :  { %s869_s10 = scalar_lea.vmem %s46_s20, 16  ;;  %s873_s13 = scalar_lea.vmem %s46_s20, 32 }
  0x4d   :  { %p870_p7 = scmp.ne.s32.totalorder %s46_s20, %s869_s10  ;;  %p874_p8 = scmp.lt.s32.totalorder %s46_s20, %s46_s20 }
  0x4e   :  { %p875_p9 = scmp.lt.s32.totalorder %s873_s13, %s869_s10 }
  0x50   :  { %p876_p10 = por %p875_p9, %p874_p8 }
  0x52   :  { %p877_p11 = pnand %p876_p10, %p870_p7 }
  0x54   :  { %880 = shalt.err (!%p877_p11)
}
  0x55   :  { %48 = dma.hbm_to_vmem [thread:$0]  %s1152_s2, 16, %s46_s20, [#allocation6]  }
  0x56   :  { %s964_s3 = smov [#allocation10]   ;;  %s881_s19 = scalar_lea.hbm %s1154_s4, 32 }
  0x57   :  { %s66_s15 = sshll.u32 %s964_s3, 4  ;;  %p882_p12 = scmp.ne.s32.totalorder %s1154_s4, %s881_s19  ;;  %s67_s15 = int_to_ptr.vmem [resolvable:$true] %s66_s15 }
  0x58   :  { %p885_p13 = scmp.lt.u32.totalorder %s881_s19, %s1154_s4 }
  0x5a   :  { %p887_p0 = pnand %p885_p13, %p882_p12 }
  0x5c   :  { %890 = shalt.err (!%p887_p0)
}
  0x5d   :  { %s891_s26 = scalar_lea.vmem %s67_s15, 32  ;;  %p896_p2 = scmp.lt.s32.totalorder %s67_s15, %s67_s15 }
  0x5e   :  { %p892_p1 = scmp.ne.s32.totalorder %s67_s15, %s891_s26  ;;  %p897_p3 = scmp.lt.s32.totalorder %s891_s26, %s891_s26 }
  0x60   :  { %p898_p4 = por %p897_p3, %p896_p2 }
  0x62   :  { %p899_p5 = pnand %p898_p4, %p892_p1 }
  0x64   :  { %902 = shalt.err (!%p899_p5)
}
  0x65   :  { %s965_s2 = smov 16   ;;  %s966_s20 = smov 1  }
  0x66   :  { %72 = dma.hbm_to_vmem [thread:$0]  %s1154_s4, 32, %s67_s15, [#allocation9], %s965_s2, %s965_s2, %s966_s20  }
  0x67   :  { %s967_s5 = smov [#allocation13]   ;;  %s903_s27 = scalar_lea.hbm %s1156_s6, 16 }
  0x68   :  { %s91_s11 = sshll.u32 %s967_s5, 4  ;;  %p904_p6 = scmp.ne.s32.totalorder %s1156_s6, %s903_s27  ;;  %s92_s11 = int_to_ptr.vmem [resolvable:$true] %s91_s11 }
  0x69   :  { %p907_p7 = scmp.lt.u32.totalorder %s903_s27, %s1156_s6 }
  0x6b   :  { %p909_p8 = pnand %p907_p7, %p904_p6 }
  0x6d   :  { %912 = shalt.err (!%p909_p8)
}
  0x6e   :  { %s913_s9 = scalar_lea.vmem %s92_s11, 16  ;;  %s917_s4 = scalar_lea.vmem %s92_s11, 32 }
  0x6f   :  { %p914_p9 = scmp.ne.s32.totalorder %s92_s11, %s913_s9  ;;  %p918_p10 = scmp.lt.s32.totalorder %s92_s11, %s92_s11 }
  0x70   :  { %p919_p11 = scmp.lt.s32.totalorder %s917_s4, %s913_s9 }
  0x72   :  { %p920_p12 = por %p919_p11, %p918_p10 }
  0x74   :  { %p921_p13 = pnand %p920_p12, %p914_p9 }
  0x76   :  { %924 = shalt.err (!%p921_p13)
}
  0x77   :  { %94 = dma.hbm_to_vmem [thread:$0]  %s1156_s6, 16, %s92_s11, [#allocation12]  }
  0x78   :  { %947 = dma.done.wait [#allocation3], 128  }
  0x79   :  { %948 = vsyncadd [#allocation3], 4294967168 }
  0x7a   :  { %949 = dma.done.wait [#allocation6], 272  }
  0x7b   :  { %950 = vsyncadd [#allocation6], 4294967024 }
  0x7c   :  { %951 = dma.done.wait [#allocation9], 4128  }
  0x7d   :  { %952 = vsyncadd [#allocation9], 4294963168 }
  0x7e   :  { %953 = dma.done.wait [#allocation12], 2064  }
  0x7f   :  { %954 = vsyncadd [#allocation12], 4294965232  ;;  %v968_v0 = vmov 0.0|0.0   ;;  %vm969_vm0 = vmmov 0   ;;  %v970_v1 = vmov 0.0   ;;  %v117_v2 = vld [vmem:[#allocation5] sm:$0xff] }
  0x80   :  { %675 = vmatprep.subr.bf16.mxu0 %v968_v0  ;;  %567 = vmatprep.mubr.msk.f32.mxu0 %vm969_vm0, %v970_v1  ;;  %v118_v3 = vld [vmem:[#allocation5 + $0x8] sm:$0xff]  ;;  %v201_v5 = vld [vmem:[#allocation8] sm:$0xff]  ;;  %v202_v6 = vld [vmem:[#allocation8 + $0x8] sm:$0xff]  ;;  %vm126_vm1 = vcmask 130048   ;;  %s971_s6 = smov [#allocation14]   ;;  %vm484_vm2 = vcmask 64512  }
  0x81   :  { %678 = vmatprep.subr.bf16.mxu1 %v968_v0  ;;  %602 = vmatprep.mubr.msk.f32.mxu1 %vm969_vm0, %v970_v1  ;;  %v676_v4 = vpack.c.bf16 %v118_v3, %v117_v2  ;;  %v203_v7 = vld [vmem:[#allocation8 + $0x10] sm:$0xff]  ;;  %v679_v8 = vpack.c.bf16 %v202_v6, %v201_v5  ;;  %v204_v9 = vld [vmem:[#allocation8 + $0x18] sm:$0xff]  ;;  %v116_v10 = vld [vmem:[#allocation2] sm:$0xff]  ;;  %s492_s0 = sshll.u32 %s971_s6, 4  ;;  %s493_s0 = int_to_ptr.vmem [resolvable:$true] %s492_s0 }
  0x82   :  { %v682_v11 = vpack.c.bf16 %v204_v9, %v203_v7  ;;  %v205_v12 = vld [vmem:[#allocation8 + $0x20] sm:$0xff]  ;;  %v206_v13 = vld [vmem:[#allocation8 + $0x28] sm:$0xff]  ;;  %v207_v15 = vld [vmem:[#allocation8 + $0x30] sm:$0xff]  ;;  %s925_s14 = scalar_lea.vmem %s493_s0, 128  ;;  %p930_p1 = scmp.lt.s32.totalorder %s493_s0, %s493_s0 }
  0x83   :  { %677 = vmatpush3.bf16.msra.mxu0 %v676_v4  ;;  %680 = vmatpush3.bf16.msra.mxu1 %v679_v8  ;;  %v685_v14 = vpack.c.bf16 %v206_v13, %v205_v12  ;;  %v208_v16 = vld [vmem:[#allocation8 + $0x38] sm:$0xff]  ;;  %v209_v18 = vld [vmem:[#allocation8 + $0x40] sm:$0xff]  ;;  %v210_v19 = vld [vmem:[#allocation8 + $0x48] sm:$0xff]  ;;  %p926_p0 = scmp.ne.s32.totalorder %s493_s0, %s925_s14  ;;  %p931_p2 = scmp.lt.s32.totalorder %s925_s14, %s925_s14 }
  0x84   :  { %702 = vmatprep.subr.bf16.mxu0 %v968_v0  ;;  %681 = vmatprep.subr.bf16.mxu1 %v968_v0  ;;  %v688_v17 = vpack.c.bf16 %v208_v16, %v207_v15  ;;  %v691_v20 = vpack.c.bf16 %v210_v19, %v209_v18  ;;  %v211_v21 = vld [vmem:[#allocation8 + $0x50] sm:$0xff]  ;;  %v212_v22 = vld [vmem:[#allocation8 + $0x58] sm:$0xff]  ;;  %v213_v24 = vld [vmem:[#allocation8 + $0x60] sm:$0xff] }
  0x85   :  { %v694_v23 = vpack.c.bf16 %v212_v22, %v211_v21  ;;  %v214_v25 = vld [vmem:[#allocation8 + $0x68] sm:$0xff]  ;;  %v215_v27 = vld [vmem:[#allocation8 + $0x70] sm:$0xff]  ;;  %v216_v28 = vld [vmem:[#allocation8 + $0x78] sm:$0xff]  ;;  %p932_p3 = por %p931_p2, %p930_p1 }
  0x86   :  { %568 = vmatmul.mubr.msk.f32.vlgmr.msra.gmra.mrb[0].mxu0 %vm126_vm1, %v116_v10  ;;  %v697_v26 = vpack.c.bf16 %v214_v25, %v213_v24  ;;  %v700_v29 = vpack.c.bf16 %v216_v28, %v215_v27  ;;  %v296_v30 = vld [vmem:[#allocation8 + $0x80] sm:$0xff]  ;;  %v297_v31 = vld [vmem:[#allocation8 + $0x88] sm:$0xff]  ;;  %v298_v32 = vld [vmem:[#allocation8 + $0x90] sm:$0xff] }
  0x87   :  { %637 = vmatprep.mubr.msk.f32.mxu0 %vm969_vm0, %v970_v1  ;;  %683 = vmatpush3.bf16.msra.mxu1 %v682_v11  ;;  %v703_v33 = vpack.c.bf16 %v297_v31, %v296_v30  ;;  %v299_v34 = vld [vmem:[#allocation8 + $0x98] sm:$0xff]  ;;  %v300_v36 = vld [vmem:[#allocation8 + $0xa0] sm:$0xff]  ;;  %v301_v37 = vld [vmem:[#allocation8 + $0xa8] sm:$0xff]  ;;  %p933_p4 = pnand %p932_p3, %p926_p0 }
  0x88   :  { %684 = vmatprep.subr.bf16.mxu1 %v968_v0  ;;  %v706_v35 = vpack.c.bf16 %v299_v34, %v298_v32  ;;  %v709_v38 = vpack.c.bf16 %v301_v37, %v300_v36  ;;  %v302_v39 = vld [vmem:[#allocation8 + $0xb0] sm:$0xff]  ;;  %v303_v40 = vld [vmem:[#allocation8 + $0xb8] sm:$0xff]  ;;  %v304_v42 = vld [vmem:[#allocation8 + $0xc0] sm:$0xff] }
  0x89   :  { %704 = vmatpush3.bf16.msra.mxu0 %v703_v33  ;;  %v712_v41 = vpack.c.bf16 %v303_v40, %v302_v39  ;;  %v305_v43 = vld [vmem:[#allocation8 + $0xc8] sm:$0xff]  ;;  %v504_v45 = vld [vmem:[#allocation7] ss:$0 sm:$0xff]  ;;  %v306_v50 = vld [vmem:[#allocation8 + $0xd0] sm:$0xff] }
  0x8a   :  { %705 = vmatprep.subr.bf16.mxu0 %v968_v0  ;;  %v715_v44 = vpack.c.bf16 %v305_v43, %v304_v42  ;;  %v307_v51 = vld [vmem:[#allocation8 + $0xd8] sm:$0xff]  ;;  %v308_v53 = vld [vmem:[#allocation8 + $0xe0] sm:$0xff]  ;;  %v309_v54 = vld [vmem:[#allocation8 + $0xe8] sm:$0xff] }
  0x8b   :  { %686 = vmatpush3.bf16.msra.mxu1 %v685_v14  ;;  %v718_v52 = vpack.c.bf16 %v307_v51, %v306_v50  ;;  %v721_v55 = vpack.c.bf16 %v309_v54, %v308_v53  ;;  %v310_v56 = vld [vmem:[#allocation8 + $0xf0] sm:$0xff]  ;;  %v311_v57 = vld [vmem:[#allocation8 + $0xf8] sm:$0xff]  ;;  %v391_v59 = vld [vmem:[#allocation11] sm:$0xff] }
  0x8c   :  { %687 = vmatprep.subr.bf16.mxu1 %v968_v0  ;;  %v724_v58 = vpack.c.bf16 %v311_v57, %v310_v56  ;;  %v392_v60 = vld [vmem:[#allocation11 + $0x8] sm:$0xff]  ;;  %v393_v61 = vld [vmem:[#allocation11 + $0x10] sm:$0xff]  ;;  %v394_v63 = vld [vmem:[#allocation11 + $0x18] sm:$0xff] }
  0x8d   :  { %707 = vmatpush3.bf16.msra.mxu0 %v706_v35  ;;  %v727_v62 = vpack.c.bf16 %v392_v60, %v391_v59  ;;  %v395_v2 = vld [vmem:[#allocation11 + $0x20] sm:$0xff]  ;;  %v396_v3 = vld [vmem:[#allocation11 + $0x28] sm:$0xff]  ;;  %v397_v5 = vld [vmem:[#allocation11 + $0x30] sm:$0xff] }
  0x8e   :  { %708 = vmatprep.subr.bf16.mxu0 %v968_v0  ;;  %v733_v4 = vpack.c.bf16 %v396_v3, %v395_v2  ;;  %v398_v6 = vld [vmem:[#allocation11 + $0x38] sm:$0xff]  ;;  %v399_v8 = vld [vmem:[#allocation11 + $0x40] sm:$0xff]  ;;  %v400_v9 = vld [vmem:[#allocation11 + $0x48] sm:$0xff] }
  0x8f   :  { %689 = vmatpush3.bf16.msra.mxu1 %v688_v17  ;;  %v736_v7 = vpack.c.bf16 %v398_v6, %v397_v5  ;;  %v739_v10 = vpack.c.bf16 %v400_v9, %v399_v8  ;;  %v506_v11 = vld [vmem:[#allocation10] ss:$0 sm:$0xff]  ;;  %v401_v16 = vld [vmem:[#allocation11 + $0x50] sm:$0xff]  ;;  %v403_v19 = vld [vmem:[#allocation11 + $0x60] sm:$0xff] }
  0x90   :  { %690 = vmatprep.subr.bf16.mxu1 %v968_v0  ;;  %v402_v17 = vld [vmem:[#allocation11 + $0x58] sm:$0xff]  ;;  %v405_v22 = vld [vmem:[#allocation11 + $0x70] sm:$0xff]  ;;  %v508_v30 = vld [vmem:[#allocation13] ss:$0 sm:$0xff] }
  0x91   :  { %710 = vmatpush3.bf16.msra.mxu0 %v709_v38  ;;  %v742_v18 = vpack.c.bf16 %v402_v17, %v401_v16  ;;  %v507_v25 = vld [vmem:[#allocation10 + $0x1] ss:$0 sm:$0xff] }
  0x92   :  { %711 = vmatprep.subr.bf16.mxu0 %v968_v0 }
  0x93   :  { %692 = vmatpush3.bf16.msra.mxu1 %v691_v20  ;;  %v404_v20 = vld [vmem:[#allocation11 + $0x68] sm:$0xff] }
  0x94   :  { %693 = vmatprep.subr.bf16.mxu1 %v968_v0  ;;  %v745_v21 = vpack.c.bf16 %v404_v20, %v403_v19 }
  0x95   :  { %713 = vmatpush3.bf16.msra.mxu0 %v712_v41 }
  0x96   :  { %714 = vmatprep.subr.bf16.mxu0 %v968_v0 }
  0x97   :  { %695 = vmatpush3.bf16.msra.mxu1 %v694_v23  ;;  %v406_v23 = vld [vmem:[#allocation11 + $0x78] sm:$0xff] }
  0x98   :  { %696 = vmatprep.subr.bf16.mxu1 %v968_v0  ;;  %v748_v24 = vpack.c.bf16 %v406_v23, %v405_v22 }
  0x99   :  { %716 = vmatpush3.bf16.msra.mxu0 %v715_v44 }
  0x9a   :  { %717 = vmatprep.subr.bf16.mxu0 %v968_v0 }
  0x9b   :  { %698 = vmatpush3.bf16.msra.mxu1 %v697_v26 }
  0x9c   :  { %699 = vmatprep.subr.bf16.mxu1 %v968_v0 }
  0x9d   :  { %719 = vmatpush3.bf16.msra.mxu0 %v718_v52 }
  0x9e   :  { %720 = vmatprep.subr.bf16.mxu0 %v968_v0 }
  0x9f   :  { %701 = vmatpush3.bf16.msra.mxu1 %v700_v29 }
  0xa0   :  { %726 = vmatprep.subr.bf16.mxu1 %v968_v0 }
  0xa1   :  { %722 = vmatpush3.bf16.msra.mxu0 %v721_v55 }
  0xa2   :  { %723 = vmatprep.subr.bf16.mxu0 %v968_v0 }
  0xa5   :  { %725 = vmatpush3.bf16.msra.mxu0 %v724_v58 }
 0x159   :  { %v196_v46 = vpop.f32.mrb[0].mxu0 }
 0x15a   :  { %v197_v47 = vadd.f32 %v504_v45, %v196_v46  ;;  %v569_v48 = vpop.f32.mrb[1].mxu0 }
 0x15c   :  { %765 = vtanh.f32 %v197_v47 }
 0x166   :  { %v766_v49 = vpop.eup %765 }
 0x167   :  { %603 = vmatmul.mubr.f32.vlgmr.msra.gmra.mrb[0].mxu1 %v766_v49 }
 0x168   :  { %672 = vmatprep.mubr.msk.f32.mxu1 %vm969_vm0, %v970_v1  ;;  %728 = vmatpush3.bf16.msra.mxu1 %v727_v62  ;;  %v730_v1 = vpack.c.bf16 %v394_v63, %v393_v61 }
 0x169   :  { %729 = vmatprep.subr.bf16.mxu1 %v968_v0 }
 0x16c   :  { %731 = vmatpush3.bf16.msra.mxu1 %v730_v1 }
 0x16d   :  { %732 = vmatprep.subr.bf16.mxu1 %v968_v0 }
 0x170   :  { %734 = vmatpush3.bf16.msra.mxu1 %v733_v4 }
 0x171   :  { %735 = vmatprep.subr.bf16.mxu1 %v968_v0 }
 0x174   :  { %737 = vmatpush3.bf16.msra.mxu1 %v736_v7 }
 0x175   :  { %738 = vmatprep.subr.bf16.mxu1 %v968_v0 }
 0x178   :  { %740 = vmatpush3.bf16.msra.mxu1 %v739_v10 }
 0x179   :  { %741 = vmatprep.subr.bf16.mxu1 %v968_v0 }
 0x17c   :  { %743 = vmatpush3.bf16.msra.mxu1 %v742_v18 }
 0x17d   :  { %744 = vmatprep.subr.bf16.mxu1 %v968_v0 }
 0x180   :  { %746 = vmatpush3.bf16.msra.mxu1 %v745_v21 }
 0x181   :  { %747 = vmatprep.subr.bf16.mxu1 %v968_v0 }
 0x184   :  { %749 = vmatpush3.bf16.msra.mxu1 %v748_v24 }
 0x23a   :  { %v290_v12 = vpop.f32.mrb[0].mxu1 }
 0x23b   :  { %v291_v13 = vadd.f32 %v506_v11, %v290_v12  ;;  %v604_v14 = vpop.f32.mrb[1].mxu1 }
 0x23d   :  { %767 = vtanh.f32 %v291_v13 }
 0x247   :  { %v768_v15 = vpop.eup %767 }
 0x248   :  { %638 = vmatmul.mubr.f32.vlgmr.msra.gmra.mrb[2].mxu0 %v768_v15 }
 0x31b   :  { %v386_v26 = vpop.f32.mrb[2].mxu0 }
 0x31c   :  { %v387_v27 = vadd.f32 %v507_v25, %v386_v26  ;;  %v639_v28 = vpop.f32.mrb[3].mxu0 }
 0x31e   :  { %769 = vtanh.f32 %v387_v27 }
 0x328   :  { %v770_v29 = vpop.eup %769 }
 0x329   :  { %673 = vmatmul.mubr.f32.vlgmr.msra.gmra.mrb[2].mxu1 %v770_v29 }
 0x3fc   :  { %v480_v31 = vpop.f32.mrb[2].mxu1 }
 0x3fd   :  { %v481_v32 = vadd.f32 %v508_v30, %v480_v31  ;;  %v674_v33 = vpop.f32.mrb[3].mxu1 }
 0x3ff   :  { %485 = vst.msk [vmem:[#allocation14] sm:$0xff] %vm484_vm2, %v481_v32 }
 0x400   :  { %936 = shalt.err (!%p933_p4)
}
 0x401   :  { %s937_s16 = scalar_lea.hbm %s1157_s7, 128 }
 0x402   :  { %p938_p5 = scmp.ne.s32.totalorder %s1157_s7, %s937_s16  ;;  %p941_p6 = scmp.lt.u32.totalorder %s937_s16, %s1157_s7 }
 0x404   :  { %p943_p7 = pnand %p941_p6, %p938_p5 }
 0x406   :  { %946 = shalt.err (!%p943_p7)
}
 0x407   :  { %495 = dma.vmem_to_hbm [thread:$0]  %s493_s0, 128, %s1157_s7, [#allocation4]  }
 0x408   :  { %955 = dma.done.wait [#allocation4], 128  }
 0x409   :  { %956 = vsyncadd [#allocation4], 4294967168 }
 0x40a   :  { %499 = vsyncpa [#allocation3], 1 }
 0x40b   :  { %500 = vsyncpa [#allocation6], 1 }
 0x40c   :  { %501 = vsyncpa [#allocation9], 1 }
 0x40d   :  { %502 = vsyncpa [#allocation12], 1 }
 0x40e   :  { %503 = vsyncpa [#allocation4], 1 }

</bundles_post_ra>
